<compile_context>
chip_gen: v5e
topology: v5e:2x2
jax: 0.10.0
libtpu: 0.0.40
codegen_flags: <defaults>
</compile_context>

<pallas_src>
import functools

import jax
import jax.numpy as jnp
from jax.experimental import pallas as pl
from jax.experimental.pallas import tpu as pltpu


# ---------------------------------------------------------------------------
# Fused MLP kernel: for one (batch, point-tile) block, run all layers:
#   h <- ReLU(W_l @ h + b_l)      (W_l, b_l are the BN-folded conv params)
# Activations are (channels, TN) with N on the lane axis throughout.
# ---------------------------------------------------------------------------
def _make_mlp_kernel(num_layers, sub, num_sub, compute_dtype):
    def kernel(x_ref, *refs):
        o_ref = refs[-1]
        # Load weights/biases once per grid step (they are VMEM-resident).
        ws = [refs[2 * l][...] for l in range(num_layers)]       # (c_out, c_in)
        bs = [refs[2 * l + 1][...] for l in range(num_layers)]   # (c_out, 1) f32
        # Lane sub-blocking keeps the live activation small (vreg-friendly).
        for s in range(num_sub):
            lo = s * sub
            h = x_ref[:, lo:lo + sub].astype(compute_dtype)      # (c_in, sub)
            for l in range(num_layers):
                acc = jnp.dot(ws[l], h, preferred_element_type=jnp.float32)
                acc = jnp.maximum(acc + bs[l], 0.0)               # bias + ReLU in f32
                h = acc if l == num_layers - 1 else acc.astype(compute_dtype)
            o_ref[:, lo:lo + sub] = h.astype(o_ref.dtype)
    return kernel


# ---------------------------------------------------------------------------
# Tile-size / VMEM budget helpers.
# ---------------------------------------------------------------------------
def _round_up(x, m):
    return ((x + m - 1) // m) * m


def _vmem_capacity_bytes():
    """Per-core VMEM capacity; conservative 64 MiB (v7x) fallback."""
    try:
        info = pltpu.get_tpu_info()
        cap = getattr(info, "vmem_capacity_bytes", None)
        if cap:
            return int(cap)
    except Exception:
        pass
    return 64 * 1024 * 1024


def _choose_point_tile(N, B, per_lane_bytes, weight_bytes, vmem_limit_bytes):
    """Largest lane tile that fits the VMEM budget and keeps >=~4 grid steps."""
    n128 = _round_up(max(N, 1), 128)
    headroom = 8 * 1024 * 1024                       # Mosaic internal scratch
    avail = max(vmem_limit_bytes - weight_bytes - headroom, 1 << 20)
    tn_cap = max(128, (avail // per_lane_bytes) // 128 * 128)
    min_steps = max(1, -(-4 // max(B, 1)))           # ceil(4 / B) tiles along N
    for tn in (8192, 4096, 3584, 3072, 2560, 2048, 1536, 1024, 512, 256, 128):
        if tn <= tn_cap and tn <= n128 and -(-n128 // tn) >= min_steps:
            return tn
    return 128


# ---------------------------------------------------------------------------
# Wrapper: x (B, C_in, N) -> (B, C_out, N), matching PyTorch MLP.forward
# (BN in eval mode, folded into the conv).
# ---------------------------------------------------------------------------
def mlp_forward(x, params, *, compute_dtype=jnp.bfloat16,
                out_dtype=jnp.float32, point_tile=None):
    B, C, N = x.shape
    num_layers = len(params)
    d_out = params[-1][0].shape[0]
    c_max = max([C] + [w.shape[0] for w, _ in params])

    # bf16 MXU inputs on v6e/v7x (also halves resident weight VMEM / DMA);
    # biases stay f32 (added to the f32 accumulator on the VPU).
    ws = [w.astype(compute_dtype) for w, _ in params]
    bs = [b.astype(jnp.float32) for _, b in params]

    # Per-generation VMEM budget (v5e/v6e 128 MiB -> 96 MiB limit; v7x 64 -> 48).
    vmem_cap = _vmem_capacity_bytes()
    vmem_limit = int(min((vmem_cap * 3) // 4, 96 * 1024 * 1024))
    weight_bytes = (sum(w.size * w.dtype.itemsize for w in ws)
                    + sum(b.size * 4 for b in bs))
    per_lane = (2 * C * x.dtype.itemsize                       # in, double-buffered
                + 2 * d_out * jnp.dtype(out_dtype).itemsize    # out, double-buffered
                + 2 * c_max * 4)                               # live f32 act headroom
    tn = point_tile if point_tile is not None else _choose_point_tile(
        N, B, per_lane, weight_bytes, vmem_limit)

    # Pad N up to a multiple of the tile -> lane-dense, unmasked stores.
    n_pad = _round_up(max(N, tn), tn)
    if n_pad != N:
        x = jnp.pad(x, ((0, 0), (0, 0), (0, n_pad - N)))

    # In-kernel lane sub-block size (keeps live activation within vregs).
    sub = 512 if tn % 512 == 0 else tn

    in_specs = [pl.BlockSpec((None, C, tn), lambda b, n: (b, 0, n))]
    operands = [x]
    for w, bb in zip(ws, bs):
        # Constant-index, single-buffered: one resident copy of each weight.
        in_specs.append(pl.BlockSpec(w.shape, lambda b, n: (0, 0),
                                     pipeline_mode=pl.Buffered(1)))
        in_specs.append(pl.BlockSpec(bb.shape, lambda b, n: (0, 0),
                                     pipeline_mode=pl.Buffered(1)))
        operands.append(w)
        operands.append(bb)

    out = pl.pallas_call(
        _make_mlp_kernel(num_layers, sub, tn // sub, compute_dtype),
        out_shape=jax.ShapeDtypeStruct((B, d_out, n_pad), out_dtype),
        grid=(B, n_pad // tn),
        in_specs=in_specs,
        out_specs=pl.BlockSpec((None, d_out, tn), lambda b, n: (b, 0, n)),
        compiler_params=pltpu.CompilerParams(
            dimension_semantics=("parallel", "parallel"),
            vmem_limit_bytes=vmem_limit,
        ),
    )(*operands)

    if n_pad != N:
        out = out[:, :, :N]
    return out


# ---------------------------------------------------------------------------
# Parameter construction: Conv1d(k=1, bias=False) + BatchNorm1d, with BN
# (eval mode) folded into the conv weight / bias.
# ---------------------------------------------------------------------------
def init_mlp_params(key, dims):
    params = []
    last = dims[0]
    for i in range(1, len(dims)):
        d = dims[i]
        key, k1, k2, k3, k4, k5 = jax.random.split(key, 6)
        w = jax.random.normal(k1, (d, last), jnp.float32) * (float(last) ** -0.5)
        gamma = 1.0 + 0.1 * jax.random.normal(k2, (d,), jnp.float32)
        beta = 0.1 * jax.random.normal(k3, (d,), jnp.float32)
        run_mean = 0.1 * jax.random.normal(k4, (d,), jnp.float32)
        run_var = jnp.abs(jax.random.normal(k5, (d,), jnp.float32)) + 0.5
        scale = gamma / jnp.sqrt(run_var + 1e-5)
        w_folded = w * scale[:, None]                       # (d, last)
        b_folded = (beta - run_mean * scale)[:, None]       # (d, 1)
        params.append((w_folded, b_folded))
        last = d
    return params


def _reference(x, params, compute_dtype=jnp.float32):
    """Pure-JAX reference of the folded MLP (optionally on the bf16 path)."""
    h = x
    for w, b in params:
        h = jnp.einsum("oc,bcn->bon", w.astype(compute_dtype),
                       h.astype(compute_dtype),
                       preferred_element_type=jnp.float32) + b[None]
        h = jnp.maximum(h, 0.0)
    return h


if __name__ == "__main__":
    B, N = 2, 1024
    dims = (4, 32, 64)

    key = jax.random.PRNGKey(0)
    kx, kp = jax.random.split(key)
    x = jax.random.normal(kx, (B, dims[0], N), jnp.float32)
    params = init_mlp_params(kp, dims)

    # 1) f32 compute path: tight check of the kernel logic against f32 ref.
    fwd_f32 = jax.jit(functools.partial(mlp_forward, compute_dtype=jnp.float32))
    out_f32 = jax.block_until_ready(fwd_f32(x, params))
    ref_f32 = _reference(x, params, jnp.float32)
    assert out_f32.shape == (B, dims[-1], N), out_f32.shape
    assert bool(jnp.allclose(out_f32, ref_f32, atol=1e-3, rtol=1e-3)), float(
        jnp.max(jnp.abs(out_f32 - ref_f32)))

    # 2) default bf16-MXU path: compare against a bf16-path reference.
    fwd = jax.jit(mlp_forward)
    out = jax.block_until_ready(fwd(x, params))
    ref_bf16 = _reference(x, params, jnp.bfloat16)
    assert out.shape == (B, dims[-1], N), out.shape
    assert out.dtype == jnp.float32
    assert bool(jnp.all(jnp.isfinite(out)))
    assert bool(jnp.allclose(out, ref_bf16, atol=1e-2, rtol=1e-2)), float(
        jnp.max(jnp.abs(out - ref_bf16)))

    # 3) ragged N: exercises the pad-to-tile / slice-back path.
    N2 = 200
    x2 = jax.random.normal(jax.random.PRNGKey(1), (B, dims[0], N2), jnp.float32)
    out2 = jax.block_until_ready(jax.jit(mlp_forward)(x2, params))
    ref2 = _reference(x2, params, jnp.bfloat16)
    assert out2.shape == (B, dims[-1], N2), out2.shape
    assert bool(jnp.allclose(out2, ref2, atol=1e-2, rtol=1e-2)), float(
        jnp.max(jnp.abs(out2 - ref2)))

    print("KERNEL_OK")
</pallas_src>

<mosaic_0001>
module attributes {stable_mosaic.version = 11 : i64} {
  func.func @kernel(%arg0: i32, %arg1: i32, %arg2: memref<1x4x512xf32, #tpu.memory_space<vmem>>, %arg3: memref<32x4xf32, #tpu.memory_space<vmem>>, %arg4: memref<32x1xf32, #tpu.memory_space<vmem>>, %arg5: memref<64x32xf32, #tpu.memory_space<vmem>>, %arg6: memref<64x1xf32, #tpu.memory_space<vmem>>, %arg7: memref<1x64x512xf32, #tpu.memory_space<vmem>>) attributes {dimension_semantics = [#tpu.dimension_semantics<parallel>, #tpu.dimension_semantics<parallel>], iteration_bounds = array<i64: 2, 2>, scalar_prefetch = 0 : i64, scratch_operands = 0 : i64, tpu.core_type = #tpu.core_type<tc>, window_params = [{transform_indices = @transform_0, window_bounds = array<i64: 1, 4, 512>}, {pipeline_mode = #tpu.pipeline_mode<synchronous>, transform_indices = @transform_1, window_bounds = array<i64: 32, 4>}, {pipeline_mode = #tpu.pipeline_mode<synchronous>, transform_indices = @transform_2, window_bounds = array<i64: 32, 1>}, {pipeline_mode = #tpu.pipeline_mode<synchronous>, transform_indices = @transform_3, window_bounds = array<i64: 64, 32>}, {pipeline_mode = #tpu.pipeline_mode<synchronous>, transform_indices = @transform_4, window_bounds = array<i64: 64, 1>}, {transform_indices = @transform_5, window_bounds = array<i64: 1, 64, 512>}]} {
    %c0 = arith.constant 0 : index
    %c0_0 = arith.constant 0 : index
    %0 = vector.load %arg3[%c0, %c0_0] : memref<32x4xf32, #tpu.memory_space<vmem>>, vector<32x4xf32>
    %c0_1 = arith.constant 0 : index
    %c0_2 = arith.constant 0 : index
    %1 = vector.load %arg5[%c0_1, %c0_2] : memref<64x32xf32, #tpu.memory_space<vmem>>, vector<64x32xf32>
    %c0_3 = arith.constant 0 : index
    %c0_4 = arith.constant 0 : index
    %2 = vector.load %arg4[%c0_3, %c0_4] : memref<32x1xf32, #tpu.memory_space<vmem>>, vector<32x1xf32>
    %c0_5 = arith.constant 0 : index
    %c0_6 = arith.constant 0 : index
    %3 = vector.load %arg6[%c0_5, %c0_6] : memref<64x1xf32, #tpu.memory_space<vmem>>, vector<64x1xf32>
    %c0_7 = arith.constant 0 : index
    %c0_8 = arith.constant 0 : index
    %c0_9 = arith.constant 0 : index
    %4 = vector.load %arg2[%c0_7, %c0_8, %c0_9] : memref<1x4x512xf32, #tpu.memory_space<vmem>>, vector<1x4x512xf32>
    %5 = vector.shape_cast %4 : vector<1x4x512xf32> to vector<4x512xf32>
    %cst = arith.constant dense<0.000000e+00> : vector<32x512xf32>
    %6 = tpu.matmul %0, %5, %cst {dimension_numbers = #tpu.dot_dimension_numbers<[1], [0], [0], [1], [0, 0, 1, 1], [], []>} : vector<32x4xf32>, vector<4x512xf32>, vector<32x512xf32> -> vector<32x512xf32>
    %7 = vector.broadcast %2 : vector<32x1xf32> to vector<32x512xf32>
    %8 = arith.addf %6, %7 : vector<32x512xf32>
    %cst_10 = arith.constant 0.000000e+00 : f32
    %9 = vector.broadcast %cst_10 : f32 to vector<32x512xf32>
    %10 = arith.maximumf %8, %9 : vector<32x512xf32>
    %cst_11 = arith.constant dense<0.000000e+00> : vector<64x512xf32>
    %11 = tpu.matmul %1, %10, %cst_11 {dimension_numbers = #tpu.dot_dimension_numbers<[1], [0], [0], [1], [0, 0, 1, 1], [], []>} : vector<64x32xf32>, vector<32x512xf32>, vector<64x512xf32> -> vector<64x512xf32>
    %12 = vector.broadcast %3 : vector<64x1xf32> to vector<64x512xf32>
    %13 = arith.addf %11, %12 : vector<64x512xf32>
    %cst_12 = arith.constant 0.000000e+00 : f32
    %14 = vector.broadcast %cst_12 : f32 to vector<64x512xf32>
    %15 = arith.maximumf %13, %14 : vector<64x512xf32>
    %c0_13 = arith.constant 0 : index
    %c0_14 = arith.constant 0 : index
    %c0_15 = arith.constant 0 : index
    %16 = vector.load %arg7[%c0_13, %c0_14, %c0_15] : memref<1x64x512xf32, #tpu.memory_space<vmem>>, vector<1x64x512xf32>
    %17 = vector.shape_cast %16 : vector<1x64x512xf32> to vector<64x512xf32>
    %18 = vector.shape_cast %15 : vector<64x512xf32> to vector<1x64x512xf32>
    tpu.vector_store %arg7[%c0_13, %c0_14, %c0_15], %18 {strides = array<i32>} : memref<1x64x512xf32, #tpu.memory_space<vmem>>, vector<1x64x512xf32>,
    return
  }
  func.func @transform_0(%arg0: i32, %arg1: i32) -> (i32, i32, i32) {
    %c0_i32 = arith.constant 0 : i32
    %c0_i32_0 = arith.constant 0 : i32
    return %arg0, %c0_i32, %arg1 : i32, i32, i32
  }
  func.func @transform_1(%arg0: i32, %arg1: i32) -> (i32, i32) {
    %c0_i32 = arith.constant 0 : i32
    %c0_i32_0 = arith.constant 0 : i32
    %c0_i32_1 = arith.constant 0 : i32
    return %c0_i32, %c0_i32_0 : i32, i32
  }
  func.func @transform_2(%arg0: i32, %arg1: i32) -> (i32, i32) {
    %c0_i32 = arith.constant 0 : i32
    %c0_i32_0 = arith.constant 0 : i32
    %c0_i32_1 = arith.constant 0 : i32
    return %c0_i32, %c0_i32_0 : i32, i32
  }
  func.func @transform_3(%arg0: i32, %arg1: i32) -> (i32, i32) {
    %c0_i32 = arith.constant 0 : i32
    %c0_i32_0 = arith.constant 0 : i32
    %c0_i32_1 = arith.constant 0 : i32
    return %c0_i32, %c0_i32_0 : i32, i32
  }
  func.func @transform_4(%arg0: i32, %arg1: i32) -> (i32, i32) {
    %c0_i32 = arith.constant 0 : i32
    %c0_i32_0 = arith.constant 0 : i32
    %c0_i32_1 = arith.constant 0 : i32
    return %c0_i32, %c0_i32_0 : i32, i32
  }
  func.func @transform_5(%arg0: i32, %arg1: i32) -> (i32, i32, i32) {
    %c0_i32 = arith.constant 0 : i32
    %c0_i32_0 = arith.constant 0 : i32
    return %arg0, %c0_i32, %arg1 : i32, i32, i32
  }
}

</mosaic_0001>

<bundles_post_ra>
// kernel: mlp_forward.1
= control target key start
LH: loop header
LB: loop body
LE: loop exit
PB: predicated region body
PF: predicated region fallthrough
CT: control target
= control target key end

     0   :  { %10 = vsyncpa [#allocation3], 0  ;;  %s1415_s0 = inlined_call_operand.vmem [shape: f32[2,4,1024], index: 0, kind: input, shape index: {}]   ;;  %s1416_s1 = inlined_call_operand.vmem [shape: f32[32,4], index: 1, kind: input, shape index: {}]   ;;  %s1417_s2 = inlined_call_operand.vmem [shape: f32[32,1], index: 2, kind: input, shape index: {}]   ;;  %s1418_s3 = inlined_call_operand.vmem [shape: f32[64,32], index: 3, kind: input, shape index: {}]   ;;  %s1419_s4 = inlined_call_operand.vmem [shape: f32[64,1], index: 4, kind: input, shape index: {}]   ;;  %s1420_s5 = inlined_call_operand.hbm [shape: f32[2,64,1024], index: 5, kind: output, shape index: {}]  }
   0x1   :  { %12 = vsyncpa [#allocation3 + $0x1], 0  ;;  %s1131_s18 = smov 0   ;;  %s1133_s19 = smov 0  }
   0x2   :  { %s1135_s20 = smov 0   ;;  %s1137_s21 = smov 0  }
   0x3   :  { %s1139_s22 = smov 0   ;;  %s1141_s23 = smov 0  }
   0x4   :  { %s1143_s24 = smov 0   ;;  %s1145_s25 = smov 0  }
   0x5 LB: > { %s856_s26 = sadd.s32 4294967295, %s1095_s25   ;;  %s857_s27 = sadd.s32 4294967294, %s1095_s25   ;;  %s1095_s25 = sphi %s1145_s25, %s18_s25   ;;  %s1091_s24 = sphi %s1143_s24, %s1435_s24   ;;  %s1087_s23 = sphi %s1141_s23, %s1434_s23   ;;  %s1083_s22 = sphi %s1139_s22, %s1433_s22   ;;  %s1079_s21 = sphi %s1137_s21, %s1432_s21   ;;  %s1075_s20 = sphi %s1135_s20, %s1431_s20   ;;  %s1071_s19 = sphi %s1133_s19, %s1430_s19   ;;  %s1067_s18 = sphi %s1131_s18, %s1429_s18  }
   0x6   : > { %s27_s28 = sadd.s32 1, %s1087_s23  ;;  %s30_s29 = sadd.s32 1, %s1091_s24 }
   0x7   : > { %p28_p0 = scmp.ge.s32.totalorder %s27_s28, 2  ;;  %p161_p1 = scmp.ne.s32.totalorder %s1075_s20, %s1071_s19 }
   0x8   : > { %p162_p2 = scmp.eq.s32.totalorder %s856_s26, 3  ;;  %p167_p5 = scmp.ne.s32.totalorder %s1071_s19, %s1067_s18 }
   0x9   : > { %s1437_s28 = smov (%p28_p0, %s27_s28), 0  ;;  %s1439_s29 = smov (!%p28_p0, %s30_s29), %s1091_s24 }
   0xa   : > { %1423 = sst [smem:[#allocation5_spill]] %s1437_s28  ;;  %s147_s30 = ssub.s32 %s1087_s23, %s1437_s28 }
   0xb   : > { %p1182_p3 = por %p162_p2, %p161_p1  ;;  %p32_p4 = scmp.ge.s32.totalorder %s1439_s29, 2 }
   0xc   : > { %p168_p6 = scmp.eq.s32.totalorder %s857_s27, 3  ;;  %p860_p7 = scmp.ge.s32.totalorder %s1095_s25, 1 }
   0xd   : > { %s1441_s29 = smov (%p32_p4, %s1439_s29), 0  ;;  %p211_p9 = scmp.lt.s32.totalorder %s1095_s25, 5 }
   0xe   : > { %1425 = sst [smem:[#allocation6_spill]] %s1441_s29  ;;  %p1191_p8 = por %p168_p6, %p167_p5 }
   0xf   : > { %s146_s8 = ssub.s32 %s1091_s24, %s1441_s29  ;;  %s151_s9 = sadd.s32 1, %s1075_s20 }
  0x10   : > { %s148_s10 = sor.u32 %s147_s30, %s146_s8  ;;  %p212_p10 = pnand %p860_p7, %p211_p9 }
  0x11   : > { %p149_p11 = scmp.eq.s32.totalorder %s148_s10, 0  ;;  %s1203_s12 = sshll.u32 (!%p212_p10), %s1079_s21, 2 }
  0x12   : > { %215 = sbr.rel (%p212_p10) target bundleno = 406 (0x196), region = 40  ;;  %p244_p12 = scmp.lt.s32.totalorder (!%p212_p10), %s1083_s22, 1 }
  0x13   : > { %s1200_s11 = scalar_select %p149_p11, %s1075_s20, %s151_s9  }
  0x14   : > { %p246_p13 = scmp.lt.s32.totalorder (!%p212_p10), %s1203_s12, 7  ;;  %s240_s13 = sand.u32 (!%p212_p10), 1, %s1071_s19  }
  0x15   : > { %s861_s14 = sshll.u32 (!%p212_p10), %s240_s13, 8  ;;  %s919_s16 = sshll.u32 (!%p212_p10), %s1083_s22, 6 }
  0x16   : > { %s768_s28 = sadd.s32 (!%p212_p10), %s919_s16, %s1203_s12 }
  0x17   : > { %v1097_v0 = vmov 0   ;;  %v267_v1 = vld [vmem:[%s1417_s2 + $0x8] sm:$0xff]  ;;  %s245_s15 = scalar_select %p244_p12, %s1083_s22, 1  ;;  %v269_v2 = vld [vmem:[%s1417_s2 + $0x18] sm:$0xff]  ;;  %v266_v3 = vld [vmem:[%s1417_s2] sm:$0xff]  ;;  %vm322_vm0 = vcmask 1043456  }
  0x18   : > { %999 = vset.pattern.permute.xlu1 %v1097_v0  ;;  %998 = vset.pattern.permute.xlu0 %v1097_v0  ;;  %s247_s21 = scalar_select %p246_p13, %s1203_s12, 7  ;;  %v268_v6 = vld [vmem:[%s1417_s2 + $0x10] sm:$0xff]  ;;  %v254_v7 = vld [vmem:[%s1416_s1] sm:$0xff]  ;;  %vm309_vm1 = vcmask 31744   ;;  %v273_v13 = vld [vmem:[%s1419_s4 + $0x18] sm:$0xff]  ;;  %vm503_vm2 = vcmask 261120  }
  0x19   : > { %287 = vperm.xlu1 %999, %v267_v1   ;;  %1000 = vset.pattern.permute.xlu2 %v1097_v0  ;;  %s863_s26 = sshll.u32 %s245_s15, 3  ;;  %v272_v12 = vld [vmem:[%s1419_s4 + $0x10] sm:$0xff]  ;;  %v255_v14 = vld [vmem:[%s1416_s1 + $0x8] sm:$0xff]  ;;  %v257_v18 = vld [vmem:[%s1416_s1 + $0x18] sm:$0xff]  ;;  %s1335_s15 = scalar_lea.vmem [#allocation2], %s861_s14 }
  0x1a   : > { %297 = vperm.xlu0 %998, %v269_v2   ;;  %s249_s27 = sadd.s32 %s863_s26, %s247_s21  ;;  %v275_v15 = vld [vmem:[%s1419_s4 + $0x28] sm:$0xff]  ;;  %v276_v16 = vld [vmem:[%s1419_s4 + $0x30] sm:$0xff]  ;;  %v258_v63 = vld [vmem:[%s1418_s3] sm:$0xff]  ;;  %s920_s22 = sshll.u32 %s768_s28, 3 }
  0x1b   : > { %s864_s30 = sshll.u32 %s249_s27, 2  ;;  %v256_v17 = vld [vmem:[%s1416_s1 + $0x10] sm:$0xff]  ;;  %s770_s12 = scalar_lea.hbm %s1420_s5, %s920_s22 }
  0x1c   : > { %s251_s10 = scalar_lea.vmem %s1415_s0, %s864_s30  ;;  %s773_s21 = sshll.u32 %s770_s12, 4  ;;  %s774_s21 = int_to_ptr.hbm [resolvable:$true] %s773_s21 }
  0x1d   : > { %v278_v4 = vld [vmem:[%s251_s10] sm:$0xff]  ;;  %v279_v5 = vld [vmem:[%s251_s10 + $0x8] sm:$0xff]  ;;  %s771_s26 = sshll.u32 %s1335_s15, 4  ;;  %s757_s27 = scalar_lea.sflag [#allocation3], %s240_s13  ;;  %s772_s26 = int_to_ptr.vmem [resolvable:$true] %s771_s26 }
  0x1e   : > { %302 = vst [vmem:[#allocation1] ss:$2 sm:$0xff] %v278_v4  ;;  %s1015_s30 = sshra.s32 %s774_s21, 4  ;;  %s1021_s14 = scalar_lea.hbm %s1420_s5, 1024  ;;  %s1016_s30 = int_to_ptr.hbm [resolvable:$true] %s1015_s30 }
  0x1f   : > { %304 = vst [vmem:[#allocation1 + $0x10] ss:$2 sm:$0xff] %v279_v5  ;;  %s1017_s8 = scalar_lea.hbm %s1016_s30, 256  ;;  %p1022_p4 = scmp.lt.s32.totalorder %s1016_s30, %s1420_s5 }
  0x20   : > { %p1018_p0 = scmp.ne.s32.totalorder %s1016_s30, %s1017_s8  ;;  %p1023_p5 = scmp.lt.s32.totalorder %s1021_s14, %s1017_s8 }
  0x21   : > { %282 = vperm.xlu1 %999, %v266_v3  }
  0x22   : > { %292 = vperm.xlu0 %998, %v268_v6   ;;  %p1019_p1 = pnand %p1018_p0, %p1182_p3  ;;  %p1024_p6 = por %p1023_p5, %p1022_p4 }
  0x24   : > { %p1020_p2 = pneg %p1019_p1 }
  0x25   : > { %v305_v8 = vld.sshfl [vmem:[#allocation1] sm:$0xff pattern:$0x75316420]  ;;  %v306_v9 = vld.sshfl [vmem:[#allocation1 + $0x8] sm:$0xff pattern:$0x75316420] }
  0x26   : > { %865 = vmatpush.msk.msra.mxu0 %vm322_vm0, %v305_v8  ;;  %870 = vmatpush.msk.msra.mxu1 %vm322_vm0, %v306_v9  ;;  %v307_v10 = vld.sshfl [vmem:[#allocation1 + $0x10] sm:$0xff pattern:$0x75316420]  ;;  %v308_v11 = vld.sshfl [vmem:[#allocation1 + $0x18] sm:$0xff pattern:$0x75316420]  ;;  %p1025_p7 = pnand %p1024_p6, %p1020_p2 }
  0x27   : > { %875 = vmatpush.msk.msra.mxu2 %vm322_vm0, %v307_v10  ;;  %880 = vmatpush.msk.msra.mxu3 %vm322_vm0, %v308_v11  ;;  %v259_v8 = vld [vmem:[%s1418_s3 + $0x8] sm:$0xff]  ;;  %v260_v9 = vld [vmem:[%s1418_s3 + $0x10] sm:$0xff]  ;;  %v270_v10 = vld [vmem:[%s1419_s4] sm:$0xff] }
  0x28   : > { %866 = vmatmul.msk.f32.vlgmr.msra.gmra.mxu0 %vm309_vm1, %v254_v7  ;;  %871 = vmatmul.msk.f32.vlgmr.msra.gmra.mxu1 %vm309_vm1, %v254_v7  ;;  %v261_v11 = vld [vmem:[%s1418_s3 + $0x18] sm:$0xff] }
  0x29   : > { %876 = vmatmul.msk.f32.vlgmr.msra.gmra.mxu2 %vm309_vm1, %v254_v7  ;;  %881 = vmatmul.msk.f32.vlgmr.msra.gmra.mxu3 %vm309_vm1, %v254_v7 }
  0x2a   : > { %475 = vperm.xlu0 %998, %v272_v12   ;;  %480 = vperm.xlu1 %999, %v273_v13   ;;  %v271_v12 = vld [vmem:[%s1419_s4 + $0x8] sm:$0xff]  ;;  %v262_v13 = vld [vmem:[%s1418_s3 + $0x20] sm:$0xff] }
  0x2b   : > { %465 = vperm.xlu2 %1000, %v270_v10  }
  0x30   : > { %867 = vmatmul.msk.f32.gmra.mxu0 %vm309_vm1, %v255_v14  ;;  %872 = vmatmul.msk.f32.gmra.mxu1 %vm309_vm1, %v255_v14 }
  0x31   : > { %877 = vmatmul.msk.f32.gmra.mxu2 %vm309_vm1, %v255_v14  ;;  %882 = vmatmul.msk.f32.gmra.mxu3 %vm309_vm1, %v255_v14  ;;  %v274_v14 = vld [vmem:[%s1419_s4 + $0x20] sm:$0xff] }
  0x32   : > { %490 = vperm.xlu0 %998, %v275_v15   ;;  %495 = vperm.xlu1 %999, %v276_v16   ;;  %v277_v15 = vld [vmem:[%s1419_s4 + $0x38] sm:$0xff]  ;;  %v263_v16 = vld [vmem:[%s1418_s3 + $0x28] sm:$0xff] }
  0x33   : > { %470 = vperm.xlu2 %1000, %v271_v12  }
  0x38   : > { %868 = vmatmul.msk.f32.gmra.mxu0 %vm309_vm1, %v256_v17  ;;  %873 = vmatmul.msk.f32.gmra.mxu1 %vm309_vm1, %v256_v17 }
  0x39   : > { %878 = vmatmul.msk.f32.gmra.mxu2 %vm309_vm1, %v256_v17  ;;  %883 = vmatmul.msk.f32.gmra.mxu3 %vm309_vm1, %v256_v17  ;;  %v264_v17 = vld [vmem:[%s1418_s3 + $0x30] sm:$0xff] }
  0x3b   : > { %485 = vperm.xlu2 %1000, %v274_v14  }
  0x40   : > { %869 = vmatmul.msk.f32.gmra.mxu0 %vm309_vm1, %v257_v18  ;;  %874 = vmatmul.msk.f32.gmra.mxu1 %vm309_vm1, %v257_v18 }
  0x41   : > { %879 = vmatmul.msk.f32.gmra.mxu2 %vm309_vm1, %v257_v18  ;;  %884 = vmatmul.msk.f32.gmra.mxu3 %vm309_vm1, %v257_v18  ;;  %v265_v18 = vld [vmem:[%s1418_s3 + $0x38] sm:$0xff] }
  0x43   : > { %500 = vperm.xlu2 %1000, %v277_v15  }
  0x8b   : > { %v288_v30 = vpop.permute.xlu1 %287 }
  0x8c   : > { %v298_v25 = vpop.permute.xlu0 %297 }
  0x93   : > { %v283_v44 = vpop.permute.xlu1 %282 }
  0x94   : > { %v293_v31 = vpop.permute.xlu0 %292 }
  0xa5   : > { %v348_v19 = vpop.f32.mrf.mxu0  ;;  %v377_v20 = vpop.f32.mrf.mxu1 }
  0xa6   : > { %v349_v47 = vadd.f32 %v348_v19, %v283_v44  ;;  %v378_v48 = vadd.f32 %v377_v20, %v283_v44  ;;  %v466_v19 = vpop.permute.xlu2 %465 }
  0xa8   : > { %v447_v57 = vmax.f32 %v349_v47, 0.0  ;;  %v448_v58 = vmax.f32 %v378_v48, 0.0 }
  0xac   : > { %v406_v21 = vpop.f32.mrf.mxu2  ;;  %v435_v22 = vpop.f32.mrf.mxu3 }
  0xad   : > { %v351_v23 = vpop.f32.mrf.mxu0  ;;  %v380_v24 = vpop.f32.mrf.mxu1  ;;  %v407_v0 = vadd.f32 %v406_v21, %v283_v44  ;;  %v436_v1 = vadd.f32 %v435_v22, %v283_v44 }
  0xae   : > { %v352_v40 = vadd.f32 %v351_v23, %v288_v30  ;;  %v381_v41 = vadd.f32 %v380_v24, %v288_v30 }
  0xaf   : > { %v449_v6 = vmax.f32 %v407_v0, 0.0  ;;  %v450_v7 = vmax.f32 %v436_v1, 0.0 }
  0xb0   : > { %v451_v49 = vmax.f32 %v352_v40, 0.0  ;;  %v452_v50 = vmax.f32 %v381_v41, 0.0 }
  0xb4   : > { %v409_v26 = vpop.f32.mrf.mxu2  ;;  %v438_v27 = vpop.f32.mrf.mxu3 }
  0xb5   : > { %v354_v28 = vpop.f32.mrf.mxu0  ;;  %v383_v29 = vpop.f32.mrf.mxu1  ;;  %v410_v59 = vadd.f32 %v409_v26, %v288_v30  ;;  %v439_v60 = vadd.f32 %v438_v27, %v288_v30 }
  0xb6   : > { %v355_v36 = vadd.f32 %v354_v28, %v293_v31  ;;  %v384_v37 = vadd.f32 %v383_v29, %v293_v31  ;;  %v471_v26 = vpop.permute.xlu2 %470 }
  0xb7   : > { %v453_v4 = vmax.f32 %v410_v59, 0.0  ;;  %v454_v5 = vmax.f32 %v439_v60, 0.0 }
  0xb8   : > { %v455_v45 = vmax.f32 %v355_v36, 0.0  ;;  %v456_v46 = vmax.f32 %v384_v37, 0.0  ;;  %v476_v37 = vpop.permute.xlu0 %475 }
  0xbc   : > { %v412_v32 = vpop.f32.mrf.mxu2  ;;  %v441_v33 = vpop.f32.mrf.mxu3 }
  0xbd   : > { %v357_v34 = vpop.f32.mrf.mxu0  ;;  %v386_v35 = vpop.f32.mrf.mxu1  ;;  %v413_v53 = vadd.f32 %v412_v32, %v293_v31  ;;  %v442_v54 = vadd.f32 %v441_v33, %v293_v31 }
  0xbe   : > { %v358_v38 = vadd.f32 %v357_v34, %v298_v25  ;;  %v387_v39 = vadd.f32 %v386_v35, %v298_v25  ;;  %v486_v1 = vpop.permute.xlu2 %485 }
  0xbf   : > { %v457_v2 = vmax.f32 %v413_v53, 0.0  ;;  %v458_v3 = vmax.f32 %v442_v54, 0.0 }
  0xc0   : > { %v459_v42 = vmax.f32 %v358_v38, 0.0  ;;  %v460_v43 = vmax.f32 %v387_v39, 0.0  ;;  %v491_v12 = vpop.permute.xlu0 %490 }
  0xc2   : > { %540 = vmatpush.msrb.mxu0 %v459_v42  ;;  %581 = vmatpush.msrb.mxu1 %v460_v43 }
  0xc4   : > { %v415_v51 = vpop.f32.mrf.mxu2  ;;  %v444_v52 = vpop.f32.mrf.mxu3  ;;  %541 = vmatpush.msrb.mxu0 %v455_v45  ;;  %582 = vmatpush.msrb.mxu1 %v456_v46 }
  0xc5   : > { %v416_v55 = vadd.f32 %v415_v51, %v298_v25  ;;  %v445_v56 = vadd.f32 %v444_v52, %v298_v25 }
  0xc6   : > { %542 = vmatpush.msrb.mxu0 %v451_v49  ;;  %583 = vmatpush.msrb.mxu1 %v452_v50  ;;  %v481_v50 = vpop.permute.xlu1 %480 }
  0xc7   : > { %v461_v61 = vmax.f32 %v416_v55, 0.0  ;;  %v462_v62 = vmax.f32 %v445_v56, 0.0 }
  0xc8   : > { %543 = vmatpush.msrb.mxu0 %v447_v57  ;;  %584 = vmatpush.msrb.mxu1 %v448_v58 }
  0xc9   : > { %622 = vmatpush.msrb.mxu2 %v461_v61  ;;  %663 = vmatpush.msrb.mxu3 %v462_v62 }
  0xca   : > { %885 = vmatmul.msk.f32.vlgmr.msrb.gmra.mxu0 %vm503_vm2, %v258_v63  ;;  %893 = vmatmul.msk.f32.vlgmr.msrb.gmra.mxu1 %vm503_vm2, %v258_v63 }
  0xcb   : > { %623 = vmatpush.msrb.mxu2 %v457_v2  ;;  %664 = vmatpush.msrb.mxu3 %v458_v3 }
  0xcd   : > { %624 = vmatpush.msrb.mxu2 %v453_v4  ;;  %665 = vmatpush.msrb.mxu3 %v454_v5 }
  0xcf   : > { %625 = vmatpush.msrb.mxu2 %v449_v6  ;;  %666 = vmatpush.msrb.mxu3 %v450_v7 }
  0xd0   : > { %901 = vmatmul.msk.f32.vlgmr.msrb.gmra.mxu2 %vm503_vm2, %v258_v63  ;;  %909 = vmatmul.msk.f32.vlgmr.msrb.gmra.mxu3 %vm503_vm2, %v258_v63 }
  0xd2   : > { %886 = vmatmul.msk.f32.gmra.mxu0 %vm503_vm2, %v259_v8  ;;  %894 = vmatmul.msk.f32.gmra.mxu1 %vm503_vm2, %v259_v8 }
  0xd8   : > { %902 = vmatmul.msk.f32.gmra.mxu2 %vm503_vm2, %v259_v8  ;;  %910 = vmatmul.msk.f32.gmra.mxu3 %vm503_vm2, %v259_v8 }
  0xda   : > { %887 = vmatmul.msk.f32.gmra.mxu0 %vm503_vm2, %v260_v9  ;;  %895 = vmatmul.msk.f32.gmra.mxu1 %vm503_vm2, %v260_v9 }
  0xe0   : > { %903 = vmatmul.msk.f32.gmra.mxu2 %vm503_vm2, %v260_v9  ;;  %911 = vmatmul.msk.f32.gmra.mxu3 %vm503_vm2, %v260_v9 }
  0xe2   : > { %888 = vmatmul.msk.f32.gmra.mxu0 %vm503_vm2, %v261_v11  ;;  %896 = vmatmul.msk.f32.gmra.mxu1 %vm503_vm2, %v261_v11 }
  0xe8   : > { %904 = vmatmul.msk.f32.gmra.mxu2 %vm503_vm2, %v261_v11  ;;  %912 = vmatmul.msk.f32.gmra.mxu3 %vm503_vm2, %v261_v11 }
  0xea   : > { %889 = vmatmul.msk.f32.gmra.mxu0 %vm503_vm2, %v262_v13  ;;  %897 = vmatmul.msk.f32.gmra.mxu1 %vm503_vm2, %v262_v13 }
  0xf0   : > { %905 = vmatmul.msk.f32.gmra.mxu2 %vm503_vm2, %v262_v13  ;;  %913 = vmatmul.msk.f32.gmra.mxu3 %vm503_vm2, %v262_v13 }
  0xf2   : > { %890 = vmatmul.msk.f32.gmra.mxu0 %vm503_vm2, %v263_v16  ;;  %898 = vmatmul.msk.f32.gmra.mxu1 %vm503_vm2, %v263_v16 }
  0xf8   : > { %906 = vmatmul.msk.f32.gmra.mxu2 %vm503_vm2, %v263_v16  ;;  %914 = vmatmul.msk.f32.gmra.mxu3 %vm503_vm2, %v263_v16 }
  0xfa   : > { %891 = vmatmul.msk.f32.gmra.mxu0 %vm503_vm2, %v264_v17  ;;  %899 = vmatmul.msk.f32.gmra.mxu1 %vm503_vm2, %v264_v17 }
 0x100   : > { %907 = vmatmul.msk.f32.gmra.mxu2 %vm503_vm2, %v264_v17  ;;  %915 = vmatmul.msk.f32.gmra.mxu3 %vm503_vm2, %v264_v17 }
 0x102   : > { %892 = vmatmul.msk.f32.gmra.mxu0 %vm503_vm2, %v265_v18  ;;  %900 = vmatmul.msk.f32.gmra.mxu1 %vm503_vm2, %v265_v18 }
 0x108   : > { %908 = vmatmul.msk.f32.gmra.mxu2 %vm503_vm2, %v265_v18  ;;  %916 = vmatmul.msk.f32.gmra.mxu3 %vm503_vm2, %v265_v18 }
 0x147   : > { %v545_v20 = vpop.f32.mrf.mxu0  ;;  %v586_v21 = vpop.f32.mrf.mxu1 }
 0x148   : > { %v546_v22 = vadd.f32 %v545_v20, %v466_v19  ;;  %v587_v23 = vadd.f32 %v586_v21, %v466_v19 }
 0x14a   : > { %v692_v24 = vmax.f32 %v546_v22, 0.0  ;;  %v693_v25 = vmax.f32 %v587_v23, 0.0 }
 0x14c   : > { %724 = vst [vmem:[%s1335_s15] sm:$0xff] %v692_v24 }
 0x14d   : > { %725 = vst [vmem:[%s1335_s15 + $0x8] sm:$0xff] %v693_v25  ;;  %v496_v25 = vpop.permute.xlu1 %495 }
 0x14f   : > { %v548_v27 = vpop.f32.mrf.mxu0  ;;  %v589_v28 = vpop.f32.mrf.mxu1 }
 0x150   : > { %v549_v29 = vadd.f32 %v548_v27, %v471_v26  ;;  %v590_v30 = vadd.f32 %v589_v28, %v471_v26 }
 0x152   : > { %v696_v31 = vmax.f32 %v549_v29, 0.0  ;;  %v697_v32 = vmax.f32 %v590_v30, 0.0 }
 0x153   : > { %v627_v33 = vpop.f32.mrf.mxu2  ;;  %v668_v34 = vpop.f32.mrf.mxu3 }
 0x154   : > { %v628_v35 = vadd.f32 %v627_v33, %v466_v19  ;;  %v669_v36 = vadd.f32 %v668_v34, %v466_v19  ;;  %728 = vst [vmem:[%s1335_s15 + $0x20] sm:$0xff] %v696_v31 }
 0x155   : > { %729 = vst [vmem:[%s1335_s15 + $0x28] sm:$0xff] %v697_v32 }
 0x156   : > { %v694_v38 = vmax.f32 %v628_v35, 0.0  ;;  %v695_v39 = vmax.f32 %v669_v36, 0.0 }
 0x157   : > { %v551_v40 = vpop.f32.mrf.mxu0  ;;  %v592_v41 = vpop.f32.mrf.mxu1 }
 0x158   : > { %v552_v42 = vadd.f32 %v551_v40, %v476_v37  ;;  %v593_v43 = vadd.f32 %v592_v41, %v476_v37  ;;  %726 = vst [vmem:[%s1335_s15 + $0x10] sm:$0xff] %v694_v38  ;;  %v501_v40 = vpop.permute.xlu2 %500 }
 0x159   : > { %727 = vst [vmem:[%s1335_s15 + $0x18] sm:$0xff] %v695_v39 }
 0x15a   : > { %v700_v44 = vmax.f32 %v552_v42, 0.0  ;;  %v701_v45 = vmax.f32 %v593_v43, 0.0 }
 0x15b   : > { %v630_v46 = vpop.f32.mrf.mxu2  ;;  %v671_v47 = vpop.f32.mrf.mxu3 }
 0x15c   : > { %732 = vst [vmem:[%s1335_s15 + $0x40] sm:$0xff] %v700_v44  ;;  %v631_v48 = vadd.f32 %v630_v46, %v471_v26  ;;  %v672_v49 = vadd.f32 %v671_v47, %v471_v26 }
 0x15d   : > { %733 = vst [vmem:[%s1335_s15 + $0x48] sm:$0xff] %v701_v45 }
 0x15e   : > { %v698_v51 = vmax.f32 %v631_v48, 0.0  ;;  %v699_v52 = vmax.f32 %v672_v49, 0.0 }
 0x15f   : > { %v554_v53 = vpop.f32.mrf.mxu0  ;;  %v595_v54 = vpop.f32.mrf.mxu1 }
 0x160   : > { %v555_v55 = vadd.f32 %v554_v53, %v481_v50  ;;  %v596_v56 = vadd.f32 %v595_v54, %v481_v50  ;;  %730 = vst [vmem:[%s1335_s15 + $0x30] sm:$0xff] %v698_v51 }
 0x161   : > { %731 = vst [vmem:[%s1335_s15 + $0x38] sm:$0xff] %v699_v52 }
 0x162   : > { %v704_v57 = vmax.f32 %v555_v55, 0.0  ;;  %v705_v58 = vmax.f32 %v596_v56, 0.0 }
 0x163   : > { %v633_v59 = vpop.f32.mrf.mxu2  ;;  %v674_v60 = vpop.f32.mrf.mxu3 }
 0x164   : > { %736 = vst [vmem:[%s1335_s15 + $0x60] sm:$0xff] %v704_v57  ;;  %v634_v61 = vadd.f32 %v633_v59, %v476_v37  ;;  %v675_v62 = vadd.f32 %v674_v60, %v476_v37 }
 0x165   : > { %737 = vst [vmem:[%s1335_s15 + $0x68] sm:$0xff] %v705_v58 }
 0x166   : > { %v702_v63 = vmax.f32 %v634_v61, 0.0  ;;  %v703_v0 = vmax.f32 %v675_v62, 0.0 }
 0x167   : > { %v557_v2 = vpop.f32.mrf.mxu0  ;;  %v598_v3 = vpop.f32.mrf.mxu1 }
 0x168   : > { %734 = vst [vmem:[%s1335_s15 + $0x50] sm:$0xff] %v702_v63  ;;  %v558_v4 = vadd.f32 %v557_v2, %v486_v1  ;;  %v599_v5 = vadd.f32 %v598_v3, %v486_v1 }
 0x169   : > { %735 = vst [vmem:[%s1335_s15 + $0x58] sm:$0xff] %v703_v0 }
 0x16a   : > { %v708_v6 = vmax.f32 %v558_v4, 0.0  ;;  %v709_v7 = vmax.f32 %v599_v5, 0.0 }
 0x16b   : > { %v636_v8 = vpop.f32.mrf.mxu2  ;;  %v677_v9 = vpop.f32.mrf.mxu3 }
 0x16c   : > { %v637_v10 = vadd.f32 %v636_v8, %v481_v50  ;;  %v678_v11 = vadd.f32 %v677_v9, %v481_v50  ;;  %740 = vst [vmem:[%s1335_s15 + $0x80] sm:$0xff] %v708_v6 }
 0x16d   : > { %741 = vst [vmem:[%s1335_s15 + $0x88] sm:$0xff] %v709_v7 }
 0x16e   : > { %v706_v13 = vmax.f32 %v637_v10, 0.0  ;;  %v707_v14 = vmax.f32 %v678_v11, 0.0 }
 0x16f   : > { %v560_v15 = vpop.f32.mrf.mxu0  ;;  %v601_v16 = vpop.f32.mrf.mxu1 }
 0x170   : > { %738 = vst [vmem:[%s1335_s15 + $0x70] sm:$0xff] %v706_v13  ;;  %v561_v17 = vadd.f32 %v560_v15, %v491_v12  ;;  %v602_v18 = vadd.f32 %v601_v16, %v491_v12 }
 0x171   : > { %739 = vst [vmem:[%s1335_s15 + $0x78] sm:$0xff] %v707_v14 }
 0x172   : > { %v712_v19 = vmax.f32 %v561_v17, 0.0  ;;  %v713_v20 = vmax.f32 %v602_v18, 0.0 }
 0x173   : > { %v639_v21 = vpop.f32.mrf.mxu2  ;;  %v680_v22 = vpop.f32.mrf.mxu3 }
 0x174   : > { %744 = vst [vmem:[%s1335_s15 + $0xa0] sm:$0xff] %v712_v19  ;;  %v640_v23 = vadd.f32 %v639_v21, %v486_v1  ;;  %v681_v24 = vadd.f32 %v680_v22, %v486_v1 }
 0x175   : > { %745 = vst [vmem:[%s1335_s15 + $0xa8] sm:$0xff] %v713_v20 }
 0x176   : > { %v710_v26 = vmax.f32 %v640_v23, 0.0  ;;  %v711_v27 = vmax.f32 %v681_v24, 0.0 }
 0x177   : > { %v563_v28 = vpop.f32.mrf.mxu0  ;;  %v604_v29 = vpop.f32.mrf.mxu1 }
 0x178   : > { %v564_v30 = vadd.f32 %v563_v28, %v496_v25  ;;  %v605_v31 = vadd.f32 %v604_v29, %v496_v25  ;;  %742 = vst [vmem:[%s1335_s15 + $0x90] sm:$0xff] %v710_v26 }
 0x179   : > { %743 = vst [vmem:[%s1335_s15 + $0x98] sm:$0xff] %v711_v27 }
 0x17a   : > { %v716_v32 = vmax.f32 %v564_v30, 0.0  ;;  %v717_v33 = vmax.f32 %v605_v31, 0.0 }
 0x17b   : > { %v642_v34 = vpop.f32.mrf.mxu2  ;;  %v683_v35 = vpop.f32.mrf.mxu3 }
 0x17c   : > { %748 = vst [vmem:[%s1335_s15 + $0xc0] sm:$0xff] %v716_v32  ;;  %v643_v36 = vadd.f32 %v642_v34, %v491_v12  ;;  %v684_v37 = vadd.f32 %v683_v35, %v491_v12 }
 0x17d   : > { %749 = vst [vmem:[%s1335_s15 + $0xc8] sm:$0xff] %v717_v33 }
 0x17e   : > { %v714_v38 = vmax.f32 %v643_v36, 0.0  ;;  %v715_v39 = vmax.f32 %v684_v37, 0.0 }
 0x17f   : > { %v566_v41 = vpop.f32.mrf.mxu0  ;;  %v607_v42 = vpop.f32.mrf.mxu1 }
 0x180   : > { %746 = vst [vmem:[%s1335_s15 + $0xb0] sm:$0xff] %v714_v38  ;;  %v567_v43 = vadd.f32 %v566_v41, %v501_v40  ;;  %v608_v44 = vadd.f32 %v607_v42, %v501_v40 }
 0x181   : > { %747 = vst [vmem:[%s1335_s15 + $0xb8] sm:$0xff] %v715_v39 }
 0x182   : > { %v720_v45 = vmax.f32 %v567_v43, 0.0  ;;  %v721_v46 = vmax.f32 %v608_v44, 0.0 }
 0x183   : > { %v645_v47 = vpop.f32.mrf.mxu2  ;;  %v686_v48 = vpop.f32.mrf.mxu3 }
 0x184   : > { %v646_v49 = vadd.f32 %v645_v47, %v496_v25  ;;  %v687_v50 = vadd.f32 %v686_v48, %v496_v25  ;;  %752 = vst [vmem:[%s1335_s15 + $0xe0] sm:$0xff] %v720_v45 }
 0x185   : > { %753 = vst [vmem:[%s1335_s15 + $0xe8] sm:$0xff] %v721_v46 }
 0x186   : > { %v718_v51 = vmax.f32 %v646_v49, 0.0  ;;  %v719_v52 = vmax.f32 %v687_v50, 0.0 }
 0x188   : > { %750 = vst [vmem:[%s1335_s15 + $0xd0] sm:$0xff] %v718_v51 }
 0x189   : > { %751 = vst [vmem:[%s1335_s15 + $0xd8] sm:$0xff] %v719_v52 }
 0x18b   : > { %v648_v53 = vpop.f32.mrf.mxu2  ;;  %v689_v54 = vpop.f32.mrf.mxu3 }
 0x18c   : > { %v649_v55 = vadd.f32 %v648_v53, %v501_v40  ;;  %v690_v56 = vadd.f32 %v689_v54, %v501_v40 }
 0x18e   : > { %v722_v57 = vmax.f32 %v649_v55, 0.0  ;;  %v723_v58 = vmax.f32 %v690_v56, 0.0 }
 0x190   : > { %754 = vst [vmem:[%s1335_s15 + $0xf0] sm:$0xff] %v722_v57 }
 0x191   : > { %755 = vst [vmem:[%s1335_s15 + $0xf8] sm:$0xff] %v723_v58 }
 0x192   : > { %1028 = shalt.err (!%p1025_p7)
}
 0x193   : > { %s1098_s13 = smov 512   ;;  %s1099_s15 = smov 1024  }
 0x194   : > { %s1100_s22 = smov 32  }
 0x195   : > { %923 = dma.vmem_to_hbm [thread:$0]  (%p1182_p3), %s772_s26, 4096, %s774_s21, %s757_s27, %s1098_s13, %s1099_s15, %s1100_s22  }
 0x196 PF: > { %p929_p9 = scmp.ge.s32.totalorder %s1095_s25, 2  ;;  %s788_s29 = sand.u32 1, %s1067_s18  }
 0x197   : > { %s789_s17 = scalar_lea.sflag [#allocation3], %s788_s29 }
 0x198   : > { %p926_p10 = pnand %p929_p9, %p1191_p8 }
 0x19a   : > { %p927_p11 = pneg %p926_p10 }
 0x19c   : > { %1062 = dma.done.wait (%p927_p11), %s789_s17, 4096  }
 0x19d   : > { %1064 = vsyncadd (%p927_p11), %s789_s17, 4294963200  ;;  %s18_s25 = sadd.s32 1, %s1095_s25   ;;  %s1427_s6 = sld [smem:[#allocation5_spill]] }
 0x19e   : > { %p15_p12 = scmp.ge.s32.totalorder %s18_s25, 6   ;;  %s1428_s12 = sld [smem:[#allocation6_spill]] }
 0x19f   : > { %s1429_s18 = smov %s1071_s19  ;;  %s1430_s19 = smov %s1075_s20 }
 0x1a0   : > { %s1431_s20 = smov %s1200_s11  ;;  %s1432_s21 = smov %s1087_s23 }
 0x1a1   : > { %s1433_s22 = smov %s1091_s24  ;;  %17 = sbr.rel (!%p15_p12) target bundleno = 5 (0x5), region = 76 }
 0x1a3   : > { %s1434_s23 = smov %s1427_s6 }
 0x1a4   : > { %s1435_s24 = smov %s1428_s12 }
 0x1a6   :  { %795 = vsyncpa [#allocation3], 1 }
 0x1a7   :  { %797 = vsyncpa [#allocation3 + $0x1], 1 }

</bundles_post_ra>
